<compile_context>
chip_gen: v7x
topology: tpu7x:2x2x1
jax: 0.10.0
libtpu: 0.0.40
codegen_flags: <defaults>
</compile_context>

<pallas_src>
import functools

import jax
import jax.numpy as jnp
from jax.experimental import pallas as pl
from jax.experimental.pallas import tpu as pltpu


def _normalization_kernel(x_ref, o_ref, *, approx: bool, input_dtype_math: bool):
    # x_ref / o_ref: (T_b, C, T_hw) block in VMEM; lane axis = flattened H*W.
    x = x_ref[...]                                   # stays in input dtype
    # f32-accumulated channel reduction; |x| is a free VPU op, recomputed below,
    # so no full-block f32 temporary is kept alive.
    denom = jnp.sum(jnp.abs(x), axis=1, keepdims=True, dtype=jnp.float32) + 1e-18
    inv = pl.reciprocal(denom, approx=approx)        # (T_b, 1, T_hw); EUP if approx
    mul_dtype = x.dtype if input_dtype_math else jnp.float32
    inv = inv.astype(mul_dtype)                      # tiny (1 row) downcast for bf16 path
    o_ref[...] = (jnp.abs(x).astype(mul_dtype) * inv).astype(o_ref.dtype)


def _round_up(x: int, m: int) -> int:
    return -(-x // m) * m


def _choose_tiles(B: int, C: int, HW: int, itemsize: int, *,
                  target_block_bytes: int = 2 << 20,
                  max_block_bytes: int = 8 << 20):
    """Pick (T_b, padded_C, T_hw) for a (T_b, C, T_hw) block, VMEM-aware."""
    # Sublane padding of the channel dim inside a VMEM tile: 8 (f32) / 16 (bf16) / 32 (i8).
    sublane = max(8, 32 // itemsize)
    c_pad = _round_up(C, sublane)
    hw_pad = _round_up(HW, 128)
    row_bytes = c_pad * itemsize                     # padded bytes per spatial lane

    # Minimum lane tile: >= 2 KiB contiguous per-channel DMA segment (and >=128 lanes).
    t_min = max(128, _round_up(2048 // itemsize, 128))
    # Budget-derived and hard-cap lane tiles (for T_b == 1).
    t_budget = max(128, (target_block_bytes // row_bytes) // 128 * 128)
    t_cap = max(128, (max_block_bytes // row_bytes) // 128 * 128)
    t_hw = min(max(t_min, t_budget), t_cap, hw_pad)

    # If one tile already covers all of HW and is far below budget, fuse batches.
    t_b = 1
    if t_hw >= hw_pad and B > 1:
        block_bytes = row_bytes * t_hw
        max_tb_budget = max(1, target_block_bytes // block_bytes)
        max_tb_parallel = max(1, -(-B // 2))         # keep >= 2 grid steps (v7x megacore)
        t_b = int(min(B, max_tb_budget, max_tb_parallel))
        while t_b > 1 and B % t_b != 0:              # avoid ragged batch blocks
            t_b -= 1
    return t_b, c_pad, t_hw


def normalization(x: jax.Array, *, approx_reciprocal=None) -> jax.Array:
    """out = |x| / (sum over channel dim of |x| + 1e-18); matches the PyTorch module."""
    B, C, H, W = x.shape
    HW = H * W
    dtype = x.dtype
    itemsize = jnp.dtype(dtype).itemsize

    is_bf16 = (dtype == jnp.bfloat16)
    if approx_reciprocal is None:
        # Exact divide for f32 (matches PyTorch); approx EUP recip is fine for bf16.
        approx_reciprocal = bool(is_bf16)
    # Keep the elementwise multiply in the input dtype only for bf16 (native on v6e/v7x);
    # f32 math path otherwise.
    input_dtype_math = bool(is_bf16)

    # Lane-dense layout: flatten spatial dims (free for contiguous NCHW).
    x2 = x.reshape(B, C, HW)

    t_b, c_pad, t_hw = _choose_tiles(B, C, HW, itemsize)
    n_b = pl.cdiv(B, t_b)
    n_hw = pl.cdiv(HW, t_hw)

    block = (t_b, C, t_hw)
    # Put the larger parallel axis first (helps v7x 2-TC sharding balance).
    if n_hw >= n_b:
        grid = (n_hw, n_b)
        index_map = lambda s, b: (b, 0, s)
    else:
        grid = (n_b, n_hw)
        index_map = lambda b, s: (b, 0, s)

    # Double-buffered in + out blocks, with the sublane-padded channel count.
    block_bytes_padded = t_b * c_pad * t_hw * itemsize
    vmem_limit = int(min(max(32 << 20, 4 * block_bytes_padded + (2 << 20)), 48 << 20))

    kernel = functools.partial(
        _normalization_kernel,
        approx=approx_reciprocal,
        input_dtype_math=input_dtype_math,
    )

    cost = pl.CostEstimate(
        flops=3 * B * C * HW,
        transcendentals=(B * HW if approx_reciprocal else 0),
        bytes_accessed=2 * B * C * HW * itemsize,
    )

    out2 = pl.pallas_call(
        kernel,
        out_shape=jax.ShapeDtypeStruct((B, C, HW), dtype),
        grid_spec=pltpu.PrefetchScalarGridSpec(
            num_scalar_prefetch=0,
            grid=grid,
            in_specs=[pl.BlockSpec(block, index_map)],
            out_specs=pl.BlockSpec(block, index_map),
        ),
        compiler_params=pltpu.CompilerParams(
            dimension_semantics=("parallel", "parallel"),
            vmem_limit_bytes=vmem_limit,
        ),
        cost_estimate=cost,
    )(x2)

    return out2.reshape(B, C, H, W)


if __name__ == "__main__":
    key = jax.random.PRNGKey(0)
    B, C, H, W = 2, 4, 16, 16
    x = jax.random.normal(key, (B, C, H, W), dtype=jnp.float32)

    # Reference (mirrors the PyTorch forward).
    sim = jnp.abs(x)
    ref = sim / (jnp.sum(sim, axis=1, keepdims=True) + 1e-18)

    # Default f32 path: exact reciprocal -> tight tolerance.
    out = normalization(x)
    jax.block_until_ready(out)
    assert out.shape == x.shape
    assert jnp.allclose(out, ref, atol=1e-6, rtol=1e-6)

    # Approximate-reciprocal path: looser tolerance (~2^-12 rel error).
    out_approx = normalization(x, approx_reciprocal=True)
    jax.block_until_ready(out_approx)
    assert jnp.allclose(out_approx, ref, atol=2e-2, rtol=2e-2)

    # bf16 fast path (input-dtype multiply + approx reciprocal by default).
    x_bf16 = x.astype(jnp.bfloat16)
    out_bf16 = normalization(x_bf16)
    jax.block_until_ready(out_bf16)
    assert out_bf16.dtype == jnp.bfloat16
    assert jnp.allclose(out_bf16.astype(jnp.float32), ref, atol=3e-2, rtol=3e-2)

    print("KERNEL_OK")
</pallas_src>

<mosaic_0001>
module attributes {stable_mosaic.version = 11 : i64} {
  func.func @_normalization_kernel(%arg0: i32, %arg1: i32, %arg2: memref<1x4x256xf32, #tpu.memory_space<vmem>>, %arg3: memref<1x4x256xf32, #tpu.memory_space<vmem>>) attributes {dimension_semantics = [#tpu.dimension_semantics<parallel>, #tpu.dimension_semantics<parallel>], iteration_bounds = array<i64: 2, 1>, scalar_prefetch = 0 : i64, scratch_operands = 0 : i64, tpu.core_type = #tpu.core_type<tc>, window_params = [{transform_indices = @transform_0, window_bounds = array<i64: 1, 4, 256>}, {transform_indices = @transform_1, window_bounds = array<i64: 1, 4, 256>}]} {
    %c0 = arith.constant 0 : index
    %c0_0 = arith.constant 0 : index
    %c0_1 = arith.constant 0 : index
    %0 = vector.load %arg2[%c0, %c0_0, %c0_1] : memref<1x4x256xf32, #tpu.memory_space<vmem>>, vector<1x4x256xf32>
    %1 = math.absf %0 : vector<1x4x256xf32>
    %cst = arith.constant dense<0.000000e+00> : vector<1x256xf32>
    %2 = vector.multi_reduction <add>, %1, %cst [1] : vector<1x4x256xf32> to vector<1x256xf32>
    %3 = vector.shape_cast %2 : vector<1x256xf32> to vector<1x1x256xf32>
    %cst_2 = arith.constant 1.000000e-18 : f32
    %4 = vector.broadcast %cst_2 : f32 to vector<1x1x256xf32>
    %5 = arith.addf %3, %4 : vector<1x1x256xf32>
    %6 = tpu.reciprocal %5 : vector<1x1x256xf32> -> vector<1x1x256xf32>
    %7 = math.absf %0 : vector<1x4x256xf32>
    %8 = vector.broadcast %6 : vector<1x1x256xf32> to vector<1x4x256xf32>
    %9 = arith.mulf %7, %8 : vector<1x4x256xf32>
    %c0_3 = arith.constant 0 : index
    %c0_4 = arith.constant 0 : index
    %c0_5 = arith.constant 0 : index
    %10 = vector.load %arg3[%c0_3, %c0_4, %c0_5] : memref<1x4x256xf32, #tpu.memory_space<vmem>>, vector<1x4x256xf32>
    tpu.vector_store %arg3[%c0_3, %c0_4, %c0_5], %9 {strides = array<i32>} : memref<1x4x256xf32, #tpu.memory_space<vmem>>, vector<1x4x256xf32>,
    return
  }
  func.func @transform_0(%arg0: i32, %arg1: i32) -> (i32, i32, i32) {
    %c0_i32 = arith.constant 0 : i32
    %c0_i32_0 = arith.constant 0 : i32
    return %arg0, %c0_i32, %arg1 : i32, i32, i32
  }
  func.func @transform_1(%arg0: i32, %arg1: i32) -> (i32, i32, i32) {
    %c0_i32 = arith.constant 0 : i32
    %c0_i32_0 = arith.constant 0 : i32
    return %arg0, %c0_i32, %arg1 : i32, i32, i32
  }
}

</mosaic_0001>

<bundles_post_ra>
// kernel: tpu_custom_call.1
= control target key start
LH: loop header
LB: loop body
LE: loop exit
PB: predicated region body
PF: predicated region fallthrough
CT: control target
= control target key end

     0   :  { %6 = vsyncpa [#allocation3], 0  ;;  %s665_s0 = inlined_call_operand.hbm [shape: f32[2,4,256], index: 0, kind: input, shape index: {}]   ;;  %s666_s1 = inlined_call_operand.hbm [shape: f32[2,4,256], index: 1, kind: output, shape index: {}]  }
   0x1   :  { %8 = vsyncpa [#allocation3 + $0x1], 0 }
   0x2   :  { %9 = vsyncpa [#allocation4], 0 }
   0x3   :  { %11 = vsyncpa [#allocation4 + $0x1], 0  ;;  %s493_s6 = smov 0   ;;  %s495_s7 = smov 0  }
   0x4   :  { %s497_s8 = smov 0   ;;  %s499_s9 = smov 0  }
   0x5   :  { %s501_s10 = smov 0   ;;  %s503_s11 = smov 0  }
   0x6 LB: > { %s284_s12 = sadd.s32 4294967295, %s479_s11   ;;  %s285_s13 = sadd.s32 4294967294, %s479_s11   ;;  %s479_s11 = sphi %s503_s11, %s17_s11   ;;  %s475_s10 = sphi %s501_s10, %s682_s10   ;;  %s471_s9 = sphi %s499_s9, %s681_s9   ;;  %s467_s8 = sphi %s497_s8, %s680_s8   ;;  %s463_s7 = sphi %s495_s7, %s679_s7   ;;  %s459_s6 = sphi %s493_s6, %s678_s6  }
   0x7   : > { %s29_s14 = sadd.s32 1, %s475_s10  ;;  %s38_s15 = sadd.s32 1, %s467_s8 }
   0x8   : > { %p31_p0 = scmp.ge.s32.totalorder %s29_s14, 2  ;;  %p45_p1 = scmp.ne.s32.totalorder %s467_s8, %s463_s7 }
   0x9   : > { %p46_p2 = scmp.eq.s32.totalorder %s479_s11, 0  ;;  %p51_p3 = scmp.ne.s32.totalorder %s463_s7, %s459_s6 }
   0xa   : > { %s684_s14 = smov (%p31_p0, %s29_s14), 0  ;;  %p52_p5 = scmp.eq.s32.totalorder %s284_s12, 0 }
   0xb   : > { %p534_p4 = por %p46_p2, %p45_p1  ;;  %s33_s17 = ssub.s32 %s475_s10, %s684_s14 }
   0xc   : > { %p77_p6 = scmp.eq.s32.totalorder %s284_s12, 1  ;;  %p36_p7 = scmp.eq.s32.totalorder %s33_s17, 0 }
   0xd   : > { %p540_p8 = por %p52_p5, %p51_p3  ;;  %p83_p10 = scmp.eq.s32.totalorder %s285_s13, 1 }
   0xe   : > { %p544_p9 = por %p77_p6, %p45_p1  ;;  %p313_p13 = scmp.lt.s32.totalorder %s479_s11, 2 }
   0xf   : > { %s549_s20 = scalar_select %p36_p7, %s467_s8, %s38_s15  }
  0x10   : > { %s670_s19 = scalar_select %p544_p9, 1, 0 }
  0x11   : > { %p551_p11 = por %p83_p10, %p51_p3  ;;  %s103_s22 = sand.u32 1, %s467_s8  }
  0x12   : > { %s288_s23 = sshll.u32 %s103_s22, 3  ;;  %s299_s24 = sshll.u32 %s475_s10, 7 }
  0x13   : > { %s671_s21 = scalar_select %p551_p11, 1, 0 }
  0x14   : > { %s562_s27 = scalar_lea.hbm %s665_s0, %s299_s24  ;;  %s107_s28 = scalar_lea.vmem [#allocation2], %s288_s23 }
  0x15   : > { %s117_s29 = sshll.u32 %s107_s28, 4  ;;  %p568_p0 = pnand %p313_p13, %p534_p4  ;;  %s564_s29 = int_to_ptr.vmem [resolvable:$true] %s117_s29 }
  0x16   : > { %s104_s2 = scalar_lea.sflag [#allocation3], %s103_s22  ;;  %s367_s3 = scalar_lea.hbm %s562_s27, 128 }
  0x17   : > { %p368_p3 = scmp.ne.s32.totalorder %s562_s27, %s367_s3  ;;  %p369_p5 = pneg %p568_p0 }
  0x18   : > { %s372_s12 = scalar_lea.hbm %s665_s0, 256  ;;  %p373_p4 = scmp.lt.u32.totalorder %s562_s27, %s665_s0 }
  0x19   : > { %p370_p6 = pnand %p369_p5, %p368_p3  ;;  %p374_p10 = scmp.lt.u32.totalorder %s372_s12, %s367_s3 }
  0x1a   : > { %p376_p12 = scmp.lt.u32.totalorder %s367_s3, %s562_s27 }
  0x1b   : > { %p371_p7 = pneg %p370_p6  ;;  %p375_p13 = por %p374_p10, %p373_p4 }
  0x1d   : > { %p377_p1 = por %p376_p12, %p375_p13 }
  0x1f   : > { %p378_p2 = pnand %p377_p1, %p371_p7 }
  0x21   : > { %381 = shalt.err (!%p378_p2)
}
  0x22   : > { %s382_s16 = scalar_lea.vmem %s564_s29, 128  ;;  %s481_s17 = smov [#allocation2]  }
  0x23   : > { %p383_p3 = scmp.ne.s32.totalorder %s564_s29, %s382_s16  ;;  %s387_s22 = sshll.u32 %s481_s17, 4  ;;  %s388_s22 = int_to_ptr.vmem [resolvable:$false] %s387_s22 }
  0x24   : > { %s389_s23 = scalar_lea.vmem %s388_s22, 256  ;;  %p390_p9 = scmp.lt.s32.totalorder %s564_s29, %s388_s22 }
  0x25   : > { %p385_p6 = pnand %p383_p3, %p369_p5  ;;  %p391_p4 = scmp.lt.s32.totalorder %s389_s23, %s382_s16 }
  0x27   : > { %p386_p11 = pneg %p385_p6  ;;  %p392_p10 = por %p391_p4, %p390_p9 }
  0x29   : > { %p393_p12 = pnand %p392_p10, %p386_p11 }
  0x2b   : > { %396 = shalt.err (!%p393_p12)
}
  0x2c   : > { %308 = dma.hbm_to_vmem [thread:$0]  (!%p568_p0), %s562_s27, 128, %s564_s29, %s104_s2  }
  0x2d   : > { %p673_p1 = scmp.lt.s32.totalorder %s479_s11, 3  ;;  %p674_p2 = scmp.ge.s32.totalorder %s479_s11, 1 }
  0x2f   : > { %p123_p5 = pnand %p674_p2, %p673_p1 }
  0x30   : > { %s604_s24 = sand.u32 (!%p123_p5), 1, %s463_s7  }
  0x31   : > { %126 = sbr.rel (%p123_p5) target bundleno = 106 (0x6a), region = 24  ;;  %s292_s25 = sshll.u32 (!%p123_p5), %s604_s24, 3 }
  0x32   : > { %s129_s26 = scalar_lea.sflag (!%p123_p5), [#allocation3], %s604_s24  ;;  %s132_s28 = scalar_lea.vmem (!%p123_p5), [#allocation2], %s292_s25 }
  0x38   : > { %450 = dma.done.wait (%p540_p8), %s129_s26, 128  }
  0x39   : > { %452 = vsyncadd (%p540_p8), %s129_s26, 4294967168  ;;  %v153_v0 = vld [vmem:[%s132_s28] sm:$0xff]  ;;  %vm158_vm0 = vcmask 1043456   ;;  %s150_s18 = scalar_lea.vmem [#allocation5], %s292_s25  ;;  %s300_s29 = sshll.u32 %s471_s9, 7 }
  0x3a   : > { %v154_v1 = vand.u32 2147483647, %v153_v0  ;;  %s200_s27 = sshll.u32 %s150_s18, 4  ;;  %s618_s3 = scalar_lea.hbm %s666_s1, %s300_s29  ;;  %s613_s27 = int_to_ptr.vmem [resolvable:$true] %s200_s27 }
  0x3b   : > { %s184_s4 = scalar_lea.sflag [#allocation4], %s604_s24  ;;  %s397_s5 = scalar_lea.vmem %s613_s27, 128 }
  0x3c   : > { %v156_v2 = vcombine.high %v154_v1, %v154_v1  ;;  %v159_v3 = vsel %vm158_vm0, %v154_v1, 0.0  ;;  %p398_p8 = scmp.ne.s32.totalorder %s613_s27, %s397_s5  ;;  %p675_p9 = scmp.ne.s32.totalorder %s670_s19, 0 }
  0x3d   : > { %v160_v4 = vrot.slane %v159_v3, 4  ;;  %s482_s9 = smov [#allocation5]  }
  0x3e   : > { %v166_v5 = vsel %vm158_vm0, %v156_v2, 0.0  ;;  %p399_p11 = pnand %p398_p8, %p675_p9  ;;  %s401_s12 = sshll.u32 %s482_s9, 4  ;;  %s402_s12 = int_to_ptr.vmem [resolvable:$false] %s401_s12 }
  0x3f   : > { %v161_v6 = vadd.f32 %v160_v4, %v159_v3  ;;  %v167_v7 = vrot.slane %v166_v5, 4  ;;  %s403_s13 = scalar_lea.vmem %s402_s12, 256  ;;  %p404_p7 = scmp.lt.s32.totalorder %s613_s27, %s402_s12 }
  0x40   : > { %p400_p0 = pneg %p399_p11  ;;  %p405_p13 = scmp.lt.s32.totalorder %s403_s13, %s397_s5 }
  0x41   : > { %v162_v8 = vrot.slane %v161_v6, 2  ;;  %v168_v9 = vadd.f32 %v167_v7, %v166_v5 }
  0x42   : > { %p406_p3 = por %p405_p13, %p404_p7 }
  0x43   : > { %v163_v10 = vadd.f32 %v162_v8, %v161_v6  ;;  %v169_v11 = vrot.slane %v168_v9, 2 }
  0x44   : > { %p407_p6 = pnand %p406_p3, %p400_p0 }
  0x45   : > { %v164_v12 = vrot.slane %v163_v10, 1  ;;  %v170_v13 = vadd.f32 %v169_v11, %v168_v9 }
  0x47   : > { %v165_v14 = vadd.f32 %v164_v12, %v163_v10  ;;  %v171_v15 = vrot.slane %v170_v13, 1 }
  0x49   : > { %v172_v16 = vadd.f32 %v171_v15, %v170_v13  ;;  %v173_v17 = vadd.f32 1e-18, %v165_v14 }
  0x4b   : > { %v174_v18 = vadd.f32 1e-18, %v172_v16  ;;  %363 = vrcp.f32 %v173_v17 }
  0x4d   : > { %365 = vrcp.f32 %v174_v18 }
  0x55   : > { %v364_v19 = vpop.eup %363 }
  0x57   : > { %v366_v20 = vpop.eup %365 }
  0x58   : > { %v179_v21 = vcombine.low %v364_v19, %v366_v20 }
  0x5a   : > { %v181_v22 = vmul.f32 %v179_v21, %v154_v1 }
  0x5c   : > { %182 = vst [vmem:[%s150_s18] sm:$0xff] %v181_v22 }
  0x5d   : > { %410 = shalt.err (!%p407_p6)
}
  0x5e   : > { %s411_s15 = scalar_lea.hbm %s618_s3, 128  ;;  %s415_s22 = scalar_lea.hbm %s666_s1, 256 }
  0x5f   : > { %p412_p4 = scmp.ne.s32.totalorder %s618_s3, %s411_s15  ;;  %p416_p1 = scmp.lt.u32.totalorder %s618_s3, %s666_s1 }
  0x60   : > { %p417_p2 = scmp.lt.u32.totalorder %s415_s22, %s411_s15  ;;  %p419_p8 = scmp.lt.u32.totalorder %s411_s15, %s618_s3 }
  0x61   : > { %p413_p10 = pnand %p412_p4, %p675_p9 }
  0x62   : > { %p418_p5 = por %p417_p2, %p416_p1 }
  0x63   : > { %p414_p12 = pneg %p413_p10 }
  0x64   : > { %p420_p11 = por %p419_p8, %p418_p5 }
  0x66   : > { %p421_p0 = pnand %p420_p11, %p414_p12 }
  0x68   : > { %424 = shalt.err (!%p421_p0)
}
  0x69   : > { %303 = dma.vmem_to_hbm [thread:$0]  (%p675_p9), %s613_s27, 128, %s618_s3, %s184_s4  }
  0x6a PF: > { %s212_s25 = sand.u32 1, %s459_s6   ;;  %p676_p7 = scmp.ne.s32.totalorder %s671_s21, 0 }
  0x6b   : > { %p677_p13 = scmp.ge.s32.totalorder %s479_s11, 2  ;;  %s213_s26 = scalar_lea.sflag [#allocation4], %s212_s25 }
  0x6d   : > { %p310_p3 = pnand %p677_p13, %p676_p7 }
  0x6f   : > { %454 = dma.done.wait (!%p310_p3), %s213_s26, 128  }
  0x70   : > { %456 = vsyncadd (!%p310_p3), %s213_s26, 4294967168  ;;  %s17_s11 = sadd.s32 1, %s479_s11   ;;  %s678_s6 = smov %s463_s7 }
  0x71   : > { %p14_p6 = scmp.ge.s32.totalorder %s17_s11, 4   ;;  %s679_s7 = smov %s467_s8 }
  0x72   : > { %s680_s8 = smov %s549_s20  ;;  %s681_s9 = smov %s475_s10 }
  0x73   : > { %s682_s10 = smov %s684_s14  ;;  %16 = sbr.rel (!%p14_p6) target bundleno = 6 (0x6), region = 69 }
  0x7a   :  { %218 = vsyncpa [#allocation3], 1 }
  0x7b   :  { %220 = vsyncpa [#allocation3 + $0x1], 1 }
  0x7c   :  { %221 = vsyncpa [#allocation4], 1 }
  0x7d   :  { %223 = vsyncpa [#allocation4 + $0x1], 1 }

</bundles_post_ra>
